<compile_context>
chip_gen: v7x
topology: tpu7x:2x2x1
jax: 0.10.0
libtpu: 0.0.40
codegen_flags: <defaults>
</compile_context>

<pallas_src>
import functools
import math

import jax
import jax.numpy as jnp
from jax.experimental import pallas as pl
from jax.experimental.pallas import tpu as pltpu

_LOG_PROB_MIN = math.log(1e-4)  # torch clamp(min=1e-4) expressed in log space


def _focal_loss_kernel(pred_ref, tgt_ref, out_ref, acc_ref, *, gamma,
                       use_alpha, alpha):
    # pred_ref: (C, T) logits tile  -- classes on sublanes, samples on lanes
    # tgt_ref : (1, T) int32 class ids; -1 marks a padded sample
    # out_ref : (8, 128) f32 per-chunk partial-sum tile (broadcast-filled)
    # acc_ref : (1, T) f32 running per-lane partial sums for this chunk
    i = pl.program_id(1)

    @pl.when(i == 0)
    def _():
        acc_ref[...] = jnp.zeros_like(acc_ref)

    logits = pred_ref[...].astype(jnp.float32)                   # (C, T)
    c, t = logits.shape
    tgt = tgt_ref[...]                                           # (1, T)

    # log-softmax over the class (sublane) axis
    m = jnp.max(logits, axis=0, keepdims=True)                   # (1, T)
    z = logits - m
    lse = jnp.log(jnp.sum(jnp.exp(z), axis=0, keepdims=True))    # (1, T)

    # Gather the target-class entry (sublane-iota compare == torch scatter_)
    # BEFORE any further transcendental / pow work.
    class_ids = jax.lax.broadcasted_iota(jnp.int32, (c, t), dimension=0)
    onehot = (class_ids == tgt).astype(jnp.float32)              # (C, T)
    z_t = jnp.sum(onehot * z, axis=0, keepdims=True)             # (1, T)
    log_p = z_t - lse                                            # log softmax @ target

    # clamp(prob, 1e-4, 1.0) done in log space (log is monotonic)
    log_p = jnp.clip(log_p, jnp.float32(_LOG_PROB_MIN), jnp.float32(0.0))
    p = jnp.exp(log_p)                                           # (1, T)
    one_minus = 1.0 - p

    g = float(gamma)
    if g == int(g) and 0.0 <= g <= 8.0:
        gi = int(g)
        if gi == 0:
            w = jnp.ones_like(one_minus)
        else:
            w = one_minus
            for _ in range(gi - 1):
                w = w * one_minus                                # VPU multiplies
    else:
        w = jnp.power(one_minus, jnp.float32(g))                 # non-integer gamma

    focal = -w * log_p                                           # (1, T)

    if use_alpha:
        alpha_col = jnp.asarray(alpha, dtype=jnp.float32).reshape(c, 1)
        alpha_t = jnp.sum(onehot * alpha_col, axis=0, keepdims=True)
        focal = focal * alpha_t

    # mask out padded samples (target == -1)
    focal = jnp.where(tgt >= 0, focal, jnp.float32(0.0))

    # one cheap VPU add per grid step; the expensive cross-lane reduce is below
    acc_ref[...] += focal

    @pl.when(i == pl.num_programs(1) - 1)
    def _():
        total = jnp.sum(acc_ref[...])                            # one XLU reduce
        out_ref[...] = jnp.broadcast_to(total, (8, 128)).astype(jnp.float32)


def _cdiv(a, b):
    return (a + b - 1) // b


def focal_loss(pred, target, class_num, *, gamma=2.0, use_alpha=False,
               alpha=None, size_average=True):
    """Pallas TPU focal loss.

    pred:   any shape reshapeable to (-1, class_num), float
    target: integer class ids, one per row of the reshaped pred
    """
    pred2d = jnp.asarray(pred).reshape(-1, class_num)
    n = pred2d.shape[0]
    c = class_num

    # (C, N) layout: classes on sublanes, samples on lanes (lane-dense).
    pred_t = pred2d.T                                            # (C, N)
    tgt_row = jnp.asarray(target).reshape(1, n).astype(jnp.int32)

    LANE = 128
    NUM_CHUNKS = 2      # leading 'parallel' axis -> megacore split on v7x
    # Per-step tile of samples; tiny VMEM footprint (C * tile_n * 4 bytes),
    # fits comfortably under the v7x / v6e / v5e scoped-VMEM limits.
    tile_n = min(2048, max(LANE, _cdiv(_cdiv(n, NUM_CHUNKS), LANE) * LANE))
    inner = _cdiv(n, NUM_CHUNKS * tile_n)
    n_total = NUM_CHUNKS * inner * tile_n
    pad = n_total - n
    if pad:
        pred_t = jnp.pad(pred_t, ((0, 0), (0, pad)))
        tgt_row = jnp.pad(tgt_row, ((0, 0), (0, pad)), constant_values=-1)

    kernel = functools.partial(
        _focal_loss_kernel,
        gamma=float(gamma),
        use_alpha=use_alpha,
        alpha=tuple(float(a) for a in alpha) if alpha is not None else None,
    )

    out = pl.pallas_call(
        kernel,
        out_shape=jax.ShapeDtypeStruct((NUM_CHUNKS * 8, 128), jnp.float32),
        grid=(NUM_CHUNKS, inner),
        in_specs=[
            pl.BlockSpec((c, tile_n), lambda ci, i: (0, ci * inner + i)),  # pred
            pl.BlockSpec((1, tile_n), lambda ci, i: (0, ci * inner + i)),  # target
        ],
        out_specs=pl.BlockSpec((8, 128), lambda ci, i: (ci, 0)),
        scratch_shapes=[pltpu.VMEM((1, tile_n), jnp.float32)],
        compiler_params=pltpu.CompilerParams(
            dimension_semantics=("parallel", "arbitrary"),
            vmem_limit_bytes=32 * 1024 * 1024),
    )(pred_t, tgt_row)

    # Each chunk's (8,128) block is filled with its partial sum.
    partials = out[::8, 0]                                       # (NUM_CHUNKS,)
    total = jnp.sum(partials)
    if size_average:
        total = total / jnp.float32(n)                           # GLOBAL row count
    return total


def _focal_loss_ref(pred, target, class_num, gamma=2.0, use_alpha=False,
                    alpha=None, size_average=True):
    # pure-JAX reference for a sanity check (mirrors the PyTorch module)
    p = jax.nn.softmax(pred.reshape(-1, class_num).astype(jnp.float32), axis=1)
    p = jnp.clip(p, 0.0001, 1.0)
    oh = jax.nn.one_hot(target.reshape(-1), class_num, dtype=jnp.float32)
    bl = -((1.0 - p) ** gamma) * jnp.log(p) * oh
    if use_alpha:
        bl = bl * jnp.asarray(alpha, jnp.float32)[None, :]
    bl = jnp.sum(bl, axis=1)
    return jnp.mean(bl) if size_average else jnp.sum(bl)


if __name__ == "__main__":
    CLASS_NUM = 8
    B, S = 4, 8   # pred (4, 8, 8) -> view(-1, 8) => 32 samples

    key = jax.random.PRNGKey(0)
    kp, kt = jax.random.split(key)
    pred = jax.random.normal(kp, (B, S, CLASS_NUM), dtype=jnp.float32)
    target = jax.random.randint(kt, (B, S), 0, CLASS_NUM, dtype=jnp.int32)

    loss = focal_loss(pred, target, CLASS_NUM, gamma=2.0, size_average=True)
    loss = jax.block_until_ready(loss)

    ref = _focal_loss_ref(pred, target, CLASS_NUM)
    assert jnp.allclose(loss, ref, rtol=1e-4, atol=1e-5), (loss, ref)

    print("KERNEL_OK")
</pallas_src>

<mosaic_0001>
module attributes {stable_mosaic.version = 11 : i64} {
  func.func @_focal_loss_kernel(%arg0: i32, %arg1: i32, %arg2: memref<8x128xf32, #tpu.memory_space<vmem>>, %arg3: memref<1x128xi32, #tpu.memory_space<vmem>>, %arg4: memref<8x128xf32, #tpu.memory_space<vmem>>, %arg5: memref<1x128xf32, #tpu.memory_space<vmem>>) attributes {dimension_semantics = [#tpu.dimension_semantics<parallel>, #tpu.dimension_semantics<arbitrary>], iteration_bounds = array<i64: 2, 1>, scalar_prefetch = 0 : i64, scratch_operands = 1 : i64, tpu.core_type = #tpu.core_type<tc>, window_params = [{transform_indices = @transform_0, window_bounds = array<i64: 8, 128>}, {transform_indices = @transform_1, window_bounds = array<i64: 1, 128>}, {transform_indices = @transform_2, window_bounds = array<i64: 8, 128>}]} {
    %c0_i32 = arith.constant 0 : i32
    %0 = arith.cmpi eq, %arg1, %c0_i32 : i32
    %1 = arith.extui %0 : i1 to i32
    %c0_i32_0 = arith.constant 0 : i32
    %2 = arith.cmpi ne, %1, %c0_i32_0 : i32
    scf.if %2 {
      %cst_18 = arith.constant 0.000000e+00 : f32
      %43 = vector.broadcast %cst_18 : f32 to vector<1x128xf32>
      %c0_19 = arith.constant 0 : index
      %c0_20 = arith.constant 0 : index
      %44 = vector.load %arg5[%c0_19, %c0_20] : memref<1x128xf32, #tpu.memory_space<vmem>>, vector<1x128xf32>
      tpu.vector_store %arg5[%c0_19, %c0_20], %43 {strides = array<i32>} : memref<1x128xf32, #tpu.memory_space<vmem>>, vector<1x128xf32>,
    } else {
    }
    %c0 = arith.constant 0 : index
    %c0_1 = arith.constant 0 : index
    %3 = vector.load %arg2[%c0, %c0_1] : memref<8x128xf32, #tpu.memory_space<vmem>>, vector<8x128xf32>
    %c0_2 = arith.constant 0 : index
    %c0_3 = arith.constant 0 : index
    %4 = vector.load %arg3[%c0_2, %c0_3] : memref<1x128xi32, #tpu.memory_space<vmem>>, vector<1x128xi32>
    %cst = arith.constant dense<0xFF800000> : vector<128xf32>
    %5 = vector.multi_reduction <maximumf>, %3, %cst [0] : vector<8x128xf32> to vector<128xf32>
    %6 = vector.shape_cast %5 : vector<128xf32> to vector<1x128xf32>
    %7 = vector.broadcast %6 : vector<1x128xf32> to vector<8x128xf32>
    %8 = arith.subf %3, %7 : vector<8x128xf32>
    %9 = math.exp %8 : vector<8x128xf32>
    %cst_4 = arith.constant dense<0.000000e+00> : vector<128xf32>
    %10 = vector.multi_reduction <add>, %9, %cst_4 [0] : vector<8x128xf32> to vector<128xf32>
    %11 = vector.shape_cast %10 : vector<128xf32> to vector<1x128xf32>
    %12 = math.log %11 : vector<1x128xf32>
    %13 = tpu.iota {dimensions = array<i32: 0>} : vector<8x128xi32>
    %14 = vector.broadcast %4 : vector<1x128xi32> to vector<8x128xi32>
    %15 = arith.cmpi eq, %13, %14 : vector<8x128xi32>
    %16 = arith.extui %15 : vector<8x128xi1> to vector<8x128xi32>
    %17 = arith.sitofp %16 : vector<8x128xi32> to vector<8x128xf32>
    %18 = arith.mulf %17, %8 : vector<8x128xf32>
    %cst_5 = arith.constant dense<0.000000e+00> : vector<128xf32>
    %19 = vector.multi_reduction <add>, %18, %cst_5 [0] : vector<8x128xf32> to vector<128xf32>
    %20 = vector.shape_cast %19 : vector<128xf32> to vector<1x128xf32>
    %21 = arith.subf %20, %12 : vector<1x128xf32>
    %cst_6 = arith.constant -9.21034049 : f32
    %cst_7 = arith.constant 0.000000e+00 : f32
    %22 = vector.broadcast %cst_6 : f32 to vector<1x128xf32>
    %23 = arith.maximumf %22, %21 : vector<1x128xf32>
    %24 = vector.broadcast %cst_7 : f32 to vector<1x128xf32>
    %25 = arith.minimumf %24, %23 : vector<1x128xf32>
    %26 = math.exp %25 : vector<1x128xf32>
    %cst_8 = arith.constant 1.000000e+00 : f32
    %27 = vector.broadcast %cst_8 : f32 to vector<1x128xf32>
    %28 = arith.subf %27, %26 : vector<1x128xf32>
    %29 = arith.mulf %28, %28 : vector<1x128xf32>
    %cst_9 = arith.constant 0.000000e+00 : f32
    %30 = vector.broadcast %cst_9 : f32 to vector<1x128xf32>
    %31 = arith.subf %30, %29 : vector<1x128xf32>
    %32 = arith.mulf %31, %25 : vector<1x128xf32>
    %c0_i32_10 = arith.constant 0 : i32
    %33 = vector.broadcast %c0_i32_10 : i32 to vector<1x128xi32>
    %34 = arith.cmpi sge, %4, %33 : vector<1x128xi32>
    %cst_11 = arith.constant 0.000000e+00 : f32
    %35 = vector.broadcast %cst_11 : f32 to vector<1x128xf32>
    %36 = arith.select %34, %32, %35 : vector<1x128xi1>, vector<1x128xf32>
    %c0_12 = arith.constant 0 : index
    %c0_13 = arith.constant 0 : index
    %37 = vector.load %arg5[%c0_12, %c0_13] : memref<1x128xf32, #tpu.memory_space<vmem>>, vector<1x128xf32>
    %38 = arith.addf %37, %36 : vector<1x128xf32>
    %c0_14 = arith.constant 0 : index
    %c0_15 = arith.constant 0 : index
    %39 = vector.load %arg5[%c0_14, %c0_15] : memref<1x128xf32, #tpu.memory_space<vmem>>, vector<1x128xf32>
    tpu.vector_store %arg5[%c0_14, %c0_15], %38 {strides = array<i32>} : memref<1x128xf32, #tpu.memory_space<vmem>>, vector<1x128xf32>,
    %c0_i32_16 = arith.constant 0 : i32
    %40 = arith.cmpi eq, %arg1, %c0_i32_16 : i32
    %41 = arith.extui %40 : i1 to i32
    %c0_i32_17 = arith.constant 0 : i32
    %42 = arith.cmpi ne, %41, %c0_i32_17 : i32
    scf.if %42 {
      %c0_18 = arith.constant 0 : index
      %c0_19 = arith.constant 0 : index
      %43 = vector.load %arg5[%c0_18, %c0_19] : memref<1x128xf32, #tpu.memory_space<vmem>>, vector<1x128xf32>
      %44 = vector.shape_cast %43 : vector<1x128xf32> to vector<1x1x128xf32>
      %cst_20 = arith.constant dense<0.000000e+00> : vector<1xf32>
      %45 = vector.multi_reduction <add>, %44, %cst_20 [1, 2] : vector<1x1x128xf32> to vector<1xf32>
      %46 = vector.shape_cast %45 : vector<1xf32> to vector<1x1x1xf32>
      %47 = vector.extract %46[0, 0, 0] : f32 from vector<1x1x1xf32>
      %48 = vector.broadcast %47 : f32 to vector<8x128xf32>
      %c0_21 = arith.constant 0 : index
      %c0_22 = arith.constant 0 : index
      %49 = vector.load %arg4[%c0_21, %c0_22] : memref<8x128xf32, #tpu.memory_space<vmem>>, vector<8x128xf32>
      tpu.vector_store %arg4[%c0_21, %c0_22], %48 {strides = array<i32>} : memref<8x128xf32, #tpu.memory_space<vmem>>, vector<8x128xf32>,
    } else {
    }
    return
  }
  func.func @transform_0(%arg0: i32, %arg1: i32) -> (i32, i32) {
    %c1_i32 = arith.constant 1 : i32
    %0 = arith.muli %arg0, %c1_i32 : i32
    %1 = arith.addi %0, %arg1 : i32
    %c0_i32 = arith.constant 0 : i32
    %c0_i32_0 = arith.constant 0 : i32
    return %c0_i32, %1 : i32, i32
  }
  func.func @transform_1(%arg0: i32, %arg1: i32) -> (i32, i32) {
    %c1_i32 = arith.constant 1 : i32
    %0 = arith.muli %arg0, %c1_i32 : i32
    %1 = arith.addi %0, %arg1 : i32
    %c0_i32 = arith.constant 0 : i32
    %c0_i32_0 = arith.constant 0 : i32
    return %c0_i32, %1 : i32, i32
  }
  func.func @transform_2(%arg0: i32, %arg1: i32) -> (i32, i32) {
    %c0_i32 = arith.constant 0 : i32
    %c0_i32_0 = arith.constant 0 : i32
    return %arg0, %c0_i32 : i32, i32
  }
}

</mosaic_0001>

<bundles_post_ra>
// kernel: tpu_custom_call.1
= control target key start
LH: loop header
LB: loop body
LE: loop exit
PB: predicated region body
PF: predicated region fallthrough
CT: control target
= control target key end

     0   :  { %7 = vsyncpa [#allocation4], 0  ;;  %s767_s0 = inlined_call_operand.hbm [shape: f32[8,256], index: 0, kind: input, shape index: {}]   ;;  %s768_s1 = inlined_call_operand.vmem [shape: s32[1,256], index: 1, kind: input, shape index: {}]   ;;  %s769_s2 = inlined_call_operand.hbm [shape: f32[16,128], index: 2, kind: output, shape index: {}]  }
   0x1   :  { %9 = vsyncpa [#allocation4 + $0x1], 0 }
   0x2   :  { %10 = vsyncpa [#allocation5], 0 }
   0x3   :  { %12 = vsyncpa [#allocation5 + $0x1], 0  ;;  %s586_s9 = smov 0   ;;  %s588_s10 = smov 0  }
   0x4   :  { %s590_s11 = smov 0   ;;  %s592_s12 = smov 0  }
   0x5   :  { %s594_s13 = smov 0   ;;  %s596_s14 = smov 0  }
   0x6 LB: > { %s369_s15 = sadd.s32 4294967295, %s566_s14   ;;  %s370_s16 = sadd.s32 4294967294, %s566_s14   ;;  %s566_s14 = sphi %s596_s14, %s18_s14   ;;  %s562_s13 = sphi %s594_s13, %s785_s13   ;;  %s558_s12 = sphi %s592_s12, %s784_s12   ;;  %s554_s11 = sphi %s590_s11, %s783_s11   ;;  %s550_s10 = sphi %s588_s10, %s782_s10   ;;  %s546_s9 = sphi %s586_s9, %s781_s9  }
   0x7   : > { %s30_s17 = sadd.s32 1, %s562_s13  ;;  %s39_s18 = sadd.s32 1, %s554_s11 }
   0x8   : > { %p32_p0 = scmp.ge.s32.totalorder %s30_s17, 2  ;;  %p46_p1 = scmp.ne.s32.totalorder %s554_s11, %s550_s10 }
   0x9   : > { %p47_p2 = scmp.eq.s32.totalorder %s566_s14, 0  ;;  %p52_p3 = scmp.ne.s32.totalorder %s550_s10, %s546_s9 }
   0xa   : > { %s787_s17 = smov (%p32_p0, %s30_s17), 0  ;;  %p53_p5 = scmp.eq.s32.totalorder %s369_s15, 0 }
   0xb   : > { %p627_p4 = por %p47_p2, %p46_p1  ;;  %s36_s20 = ssub.s32 %s562_s13, %s787_s17 }
   0xc   : > { %p104_p6 = scmp.eq.s32.totalorder %s369_s15, 1  ;;  %p37_p7 = scmp.eq.s32.totalorder %s36_s20, 0 }
   0xd   : > { %p633_p8 = por %p53_p5, %p52_p3  ;;  %p110_p10 = scmp.eq.s32.totalorder %s370_s16, 1 }
   0xe   : > { %p637_p9 = por %p104_p6, %p46_p1  ;;  %p397_p13 = scmp.lt.s32.totalorder %s566_s14, 2 }
   0xf   : > { %s642_s23 = scalar_select %p37_p7, %s554_s11, %s39_s18  }
  0x10   : > { %s773_s22 = scalar_select %p637_p9, 1, 0 }
  0x11   : > { %p644_p11 = por %p110_p10, %p52_p3  ;;  %s130_s25 = sand.u32 1, %s554_s11  }
  0x12   : > { %s373_s26 = sshll.u32 %s130_s25, 3  ;;  %s374_s27 = sshll.u32 %s562_s13, 7 }
  0x13   : > { %s774_s24 = scalar_select %p644_p11, 1, 0 }
  0x14   : > { %s655_s30 = scalar_lea.hbm %s767_s0, %s374_s27  ;;  %s134_s3 = scalar_lea.vmem [#allocation3], %s373_s26 }
  0x15   : > { %s142_s4 = sshll.u32 %s134_s3, 4  ;;  %p661_p0 = pnand %p397_p13, %p627_p4  ;;  %s657_s4 = int_to_ptr.vmem [resolvable:$true] %s142_s4 }
  0x16   : > { %s131_s6 = scalar_lea.sflag [#allocation4], %s130_s25  ;;  %s454_s7 = scalar_lea.hbm %s655_s30, 128 }
  0x17   : > { %p455_p3 = scmp.ne.s32.totalorder %s655_s30, %s454_s7  ;;  %p456_p5 = pneg %p661_p0 }
  0x18   : > { %s459_s16 = scalar_lea.hbm %s767_s0, 256  ;;  %p460_p4 = scmp.lt.u32.totalorder %s655_s30, %s767_s0 }
  0x19   : > { %p457_p6 = pnand %p456_p5, %p455_p3  ;;  %p461_p10 = scmp.lt.u32.totalorder %s459_s16, %s454_s7 }
  0x1a   : > { %p463_p12 = scmp.lt.u32.totalorder %s454_s7, %s655_s30 }
  0x1b   : > { %p458_p7 = pneg %p457_p6  ;;  %p462_p13 = por %p461_p10, %p460_p4 }
  0x1d   : > { %p464_p1 = por %p463_p12, %p462_p13 }
  0x1f   : > { %p465_p2 = pnand %p464_p1, %p458_p7 }
  0x21   : > { %468 = shalt.err (!%p465_p2)
}
  0x22   : > { %s469_s20 = scalar_lea.vmem %s657_s4, 128  ;;  %s568_s25 = smov [#allocation3]  }
  0x23   : > { %p470_p3 = scmp.ne.s32.totalorder %s657_s4, %s469_s20  ;;  %s474_s26 = sshll.u32 %s568_s25, 4  ;;  %s475_s26 = int_to_ptr.vmem [resolvable:$false] %s474_s26 }
  0x24   : > { %s476_s27 = scalar_lea.vmem %s475_s26, 256  ;;  %p477_p9 = scmp.lt.s32.totalorder %s657_s4, %s475_s26 }
  0x25   : > { %p472_p6 = pnand %p470_p3, %p456_p5  ;;  %p478_p4 = scmp.lt.s32.totalorder %s476_s27, %s469_s20 }
  0x27   : > { %p473_p11 = pneg %p472_p6  ;;  %p479_p10 = por %p478_p4, %p477_p9 }
  0x29   : > { %p480_p12 = pnand %p479_p10, %p473_p11 }
  0x2b   : > { %483 = shalt.err (!%p480_p12)
}
  0x2c   : > { %392 = dma.hbm_to_vmem [thread:$0]  (!%p661_p0), %s655_s30, 128, %s657_s4, %s131_s6  }
  0x2d   : > { %p776_p1 = scmp.lt.s32.totalorder %s566_s14, 3  ;;  %p777_p2 = scmp.ge.s32.totalorder %s566_s14, 1 }
  0x2f   : > { %p156_p5 = pnand %p777_p2, %p776_p1 }
  0x30   : > { %s697_s28 = sand.u32 (!%p156_p5), 1, %s550_s10  }
  0x31   : > { %159 = sbr.rel (%p156_p5) target bundleno = 368 (0x170), region = 28  ;;  %s376_s29 = sshll.u32 (!%p156_p5), %s697_s28, 3 }
  0x32   : > { %s162_s3 = scalar_lea.sflag (!%p156_p5), [#allocation4], %s697_s28  ;;  %s165_s5 = scalar_lea.vmem (!%p156_p5), [#allocation3], %s376_s29 }
  0x38   : > { %537 = dma.done.wait (%p633_p8), %s162_s3, 128  }
  0x39   : > { %539 = vsyncadd (%p633_p8), %s162_s3, 4294967168  ;;  %v569_v0 = vmov 0.0   ;;  %v201_v1 = vld [vmem:[%s165_s5] sm:$0xff]  ;;  %p192_p9 = scmp.lt.s32.totalorder %s558_s12, 1  ;;  %v220_v4 = vlaneseq  ;;  %vm254_vm2 = vcmask 1040384   ;;  %s189_s21 = scalar_lea.vmem [#allocation6], %s376_s29 }
  0x3a   : > { %200 = vst [vmem:[#allocation2] sm:$0x1] %v569_v0  ;;  %v203_v2 = vrot.slane %v201_v1, 4  ;;  %s281_s8 = sshll.u32 %s189_s21, 4  ;;  %s380_s15 = sshll.u32 %s558_s12, 7  ;;  %s715_s8 = int_to_ptr.vmem [resolvable:$true] %s281_s8 }
  0x3b   : > { %s193_s30 = scalar_select %p192_p9, %s558_s12, 1  ;;  %v221_v7 = vshrl.u32 %v220_v4, 7 }
  0x3c   : > { %v204_v3 = vmax.f32 %v201_v1, %v203_v2  ;;  %s720_s20 = scalar_lea.hbm %s769_s2, %s380_s15  ;;  %s268_s25 = scalar_lea.sflag [#allocation5], %s697_s28 }
  0x3d   : > { %s194_s7 = scalar_lea.vmem %s768_s1, %s193_s30  ;;  %v224_v10 = vsub.s32 0, %v221_v7  ;;  %s484_s26 = scalar_lea.vmem %s715_s8, 128 }
  0x3e   : > { %v205_v5 = vrot.slane %v204_v3, 2  ;;  %v202_v11 = vld [vmem:[%s194_s7] sm:$0x1]  ;;  %p485_p8 = scmp.ne.s32.totalorder %s715_s8, %s484_s26  ;;  %p778_p11 = scmp.ne.s32.totalorder %s773_s22, 0 }
  0x3f   : > { %v225_v14 = vrot.slane %v202_v11, %v224_v10  ;;  %vm245_vm1 = vcmp.ge.s32.totalorder %v202_v11, 0  ;;  %s570_s12 = smov [#allocation6]  }
  0x40   : > { %v206_v6 = vmax.f32 %v204_v3, %v205_v5  ;;  %p486_p0 = pnand %p485_p8, %p778_p11  ;;  %s488_s27 = sshll.u32 %s570_s12, 4  ;;  %s489_s27 = int_to_ptr.vmem [resolvable:$false] %s488_s27 }
  0x41   : > { %vm226_vm0 = vcmp.eq.s32.totalorder %v221_v7, %v225_v14  ;;  %v247_v41 = vld [vmem:[#allocation2] sm:$0x1]  ;;  %s490_s29 = scalar_lea.vmem %s489_s27, 256  ;;  %p491_p13 = scmp.lt.s32.totalorder %s715_s8, %s489_s27 }
  0x42   : > { %v207_v8 = vrot.slane %v206_v6, 1  ;;  %v378_v15 = vsel %vm226_vm0, 1.0, %v569_v0  ;;  %p487_p7 = pneg %p486_p0  ;;  %p492_p3 = scmp.lt.s32.totalorder %s490_s29, %s484_s26 }
  0x44   : > { %v208_v9 = vmax.f32 %v206_v6, %v207_v8  ;;  %p493_p6 = por %p492_p3, %p491_p13 }
  0x46   : > { %v209_v12 = vsub.f32 %v201_v1, %v208_v9  ;;  %p494_p4 = pnand %p493_p6, %p487_p7 }
  0x48   : > { %v210_v13 = vmul.f32 1.442695, %v209_v12  ;;  %v229_v16 = vmul.f32 %v378_v15, %v209_v12 }
  0x4a   : > { %448 = vpow2.f32 %v210_v13  ;;  %v230_v19 = vrot.slane %v229_v16, 4 }
  0x4c   : > { %v231_v22 = vadd.f32 %v230_v19, %v229_v16 }
  0x4e   : > { %v232_v25 = vrot.slane %v231_v22, 2 }
  0x50   : > { %v233_v27 = vadd.f32 %v232_v25, %v231_v22 }
  0x52   : > { %v234_v28 = vrot.slane %v233_v27, 1 }
  0x54   : > { %v449_v17 = vpop.eup %448  ;;  %v235_v29 = vadd.f32 %v234_v28, %v233_v27 }
  0x55   : > { %v212_v18 = vrot.slane %v449_v17, 4 }
  0x57   : > { %v213_v20 = vadd.f32 %v449_v17, %v212_v18 }
  0x59   : > { %v214_v21 = vrot.slane %v213_v20, 2 }
  0x5b   : > { %v215_v23 = vadd.f32 %v214_v21, %v213_v20 }
  0x5d   : > { %v216_v24 = vrot.slane %v215_v23, 1 }
  0x5f   : > { %v217_v26 = vadd.f32 %v216_v24, %v215_v23 }
  0x61   : > { %450 = vlog2.f32 %v217_v26 }
  0x6b   : > { %v451_v30 = vpop.eup %450 }
  0x6c   : > { %v219_v31 = vmul.f32 0.6931472, %v451_v30 }
  0x6e   : > { %v236_v32 = vsub.f32 %v235_v29, %v219_v31 }
  0x70   : > { %v237_v33 = vmax.f32 %v236_v32, -9.2103405 }
  0x72   : > { %v238_v34 = vmin.f32 %v237_v33, 0.0 }
  0x74   : > { %v239_v35 = vmul.f32 1.442695, %v238_v34 }
  0x76   : > { %452 = vpow2.f32 %v239_v35 }
  0x80   : > { %v453_v36 = vpop.eup %452 }
  0x81   : > { %v241_v37 = vsub.f32 1.0, %v453_v36 }
  0x83   : > { %v242_v38 = vmul.f32 %v241_v37, %v241_v37 }
  0x85   : > { %v243_v39 = vsub.f32 0.0, %v242_v38 }
  0x87   : > { %v244_v40 = vmul.f32 %v243_v39, %v238_v34 }
  0x89   : > { %v246_v42 = vsel %vm245_vm1, %v244_v40, 0.0 }
  0x8a   : > { %v248_v43 = vadd.f32 %v247_v41, %v246_v42 }
  0x8c   : > { %249 = vst [vmem:[#allocation2] sm:$0x1] %v248_v43 }
  0x93   : > { %v253_v44 = vld [vmem:[#allocation2] sm:$0x1] }
  0x94   : > { %v255_v45 = vsel %vm254_vm2, %v253_v44, 0.0 }
  0x95   : > { %256 = vadd.xlane.f32.xlu0 %v255_v45 }
 0x122   : > { %v257_v46 = vpop.xlane.xlu0 %256 }
 0x123   : > { %v258_v47 = vrot.slane %v257_v46, 4 }
 0x125   : > { %v259_v48 = vadd.f32 %v258_v47, %v257_v46 }
 0x127   : > { %v260_v49 = vrot.slane %v259_v48, 2 }
 0x129   : > { %v261_v50 = vadd.f32 %v260_v49, %v259_v48 }
 0x12b   : > { %v262_v51 = vrot.slane %v261_v50, 1 }
 0x12d   : > { %v263_v52 = vadd.f32 %v262_v51, %v261_v50 }
 0x12f   : > { %383 = vpush %v263_v52 }
 0x160   : > { %s384_s16 = spop %383 }
 0x161   : > { %v265_v53 = vstv %s384_s16 }
 0x162   : > { %266 = vst [vmem:[%s189_s21] sm:$0xff] %v265_v53 }
 0x163   : > { %497 = shalt.err (!%p494_p4)
}
 0x164   : > { %s498_s28 = scalar_lea.hbm %s720_s20, 128  ;;  %s502_s30 = scalar_lea.hbm %s769_s2, 256 }
 0x165   : > { %p499_p10 = scmp.ne.s32.totalorder %s720_s20, %s498_s28  ;;  %p503_p2 = scmp.lt.u32.totalorder %s720_s20, %s769_s2 }
 0x166   : > { %p504_p5 = scmp.lt.u32.totalorder %s502_s30, %s498_s28  ;;  %p506_p8 = scmp.lt.u32.totalorder %s498_s28, %s720_s20 }
 0x167   : > { %p500_p12 = pnand %p499_p10, %p778_p11 }
 0x168   : > { %p505_p9 = por %p504_p5, %p503_p2 }
 0x169   : > { %p501_p1 = pneg %p500_p12 }
 0x16a   : > { %p507_p0 = por %p506_p8, %p505_p9 }
 0x16c   : > { %p508_p7 = pnand %p507_p0, %p501_p1 }
 0x16e   : > { %511 = shalt.err (!%p508_p7)
}
 0x16f   : > { %387 = dma.vmem_to_hbm [thread:$0]  (%p778_p11), %s715_s8, 128, %s720_s20, %s268_s25  }
 0x170 PF: > { %s293_s7 = sand.u32 1, %s546_s9   ;;  %p779_p13 = scmp.ne.s32.totalorder %s774_s24, 0 }
 0x171   : > { %p780_p3 = scmp.ge.s32.totalorder %s566_s14, 2  ;;  %s294_s21 = scalar_lea.sflag [#allocation5], %s293_s7 }
 0x173   : > { %p394_p6 = pnand %p780_p3, %p779_p13 }
 0x175   : > { %541 = dma.done.wait (!%p394_p6), %s294_s21, 128  }
 0x176   : > { %543 = vsyncadd (!%p394_p6), %s294_s21, 4294967168  ;;  %s18_s14 = sadd.s32 1, %s566_s14   ;;  %s781_s9 = smov %s550_s10 }
 0x177   : > { %p15_p4 = scmp.ge.s32.totalorder %s18_s14, 4   ;;  %s782_s10 = smov %s554_s11 }
 0x178   : > { %s783_s11 = smov %s642_s23  ;;  %s784_s12 = smov %s562_s13 }
 0x179   : > { %s785_s13 = smov %s787_s17  ;;  %17 = sbr.rel (!%p15_p4) target bundleno = 6 (0x6), region = 84 }
 0x180   :  { %299 = vsyncpa [#allocation4], 1 }
 0x181   :  { %301 = vsyncpa [#allocation4 + $0x1], 1 }
 0x182   :  { %302 = vsyncpa [#allocation5], 1 }
 0x183   :  { %304 = vsyncpa [#allocation5 + $0x1], 1 }

</bundles_post_ra>
